<compile_context>
chip_gen: v7x
topology: tpu7x:2x2x1
jax: 0.10.0
libtpu: 0.0.40
codegen_flags: <defaults>
</compile_context>

<pallas_src>
import functools

import jax
import jax.numpy as jnp
from jax.experimental import pallas as pl
from jax.experimental.pallas import tpu as pltpu


def _round_up(x, m):
    return ((x + m - 1) // m) * m


def _tensorcores_per_device():
    """TensorCores per chip: 1 on v5e/v6e, 2 on v7x.  Defensive lookup."""
    try:
        info = pltpu.get_tpu_info()
        for name in ("num_cores", "core_count", "num_tensorcores", "tensorcore_count"):
            val = getattr(info, name, None)
            if isinstance(val, int) and val > 0:
                # Per-chip TC count is at most 2 on every current generation.
                return max(1, min(int(val), 2))
    except Exception:
        pass
    try:
        kind = jax.devices()[0].device_kind.lower()
        if "v7" in kind or "7x" in kind:
            return 2
    except Exception:
        pass
    return 1


def prepare_params(emb_table, w1, b1, w2, b2):
    """One-time (model-init) padding + casting.  NOT part of the per-call path.

    Feature dims are zero-padded to multiples of 128 (lane-dense), matmul
    operands cast to bf16, biases kept f32.
    """
    V, E = emb_table.shape
    H = w1.shape[1]
    O = w2.shape[1]
    E_pad = _round_up(E, 128)
    H_pad = _round_up(H, 128)
    O_pad = _round_up(O, 128)

    emb_p = jnp.pad(emb_table, ((0, 0), (0, E_pad - E))).astype(jnp.bfloat16)
    w1_p = jnp.pad(w1, ((0, E_pad - E), (0, H_pad - H))).astype(jnp.bfloat16)
    b1_p = jnp.pad(b1, (0, H_pad - H)).astype(jnp.float32).reshape(1, H_pad)
    w2_p = jnp.pad(w2, ((0, H_pad - H), (0, O_pad - O))).astype(jnp.bfloat16)
    b2_p = jnp.pad(b2, (0, O_pad - O)).astype(jnp.float32).reshape(1, O_pad)
    return emb_p, w1_p, b1_p, w2_p, b2_p


def _mlp_kernel(x_ref, w1_ref, b1_ref, w2_ref, b2_ref, o_ref):
    # x_ref:  (TM, E_pad)    bf16 tile of embedded tokens
    # w1_ref: (E_pad, H_pad) bf16   b1_ref: (1, H_pad) f32
    # w2_ref: (H_pad, O_pad) bf16   b2_ref: (1, O_pad) f32
    # o_ref:  (TM, O_pad)    f32
    h = jnp.dot(x_ref[...], w1_ref[...], preferred_element_type=jnp.float32)
    h = jnp.maximum(h + b1_ref[...], 0.0)  # bias + ReLU on the VPU (f32)
    out = jnp.dot(h.astype(jnp.bfloat16), w2_ref[...],
                  preferred_element_type=jnp.float32)
    o_ref[...] = (out + b2_ref[...]).astype(o_ref.dtype)


@functools.partial(jax.jit,
                   static_argnames=("output_dim", "num_cores", "max_tile_m"))
def feedforward_nn(tokens, emb_p, w1_p, b1_p, w2_p, b2_p, *, output_dim,
                   num_cores=1, max_tile_m=1024):
    """tokens: (B, S) int32.  Params are the pre-padded outputs of prepare_params.

    Returns (B, S, output_dim) float32.
    """
    B, S = tokens.shape
    E_pad = emb_p.shape[1]
    H_pad = w1_p.shape[1]
    O_pad = w2_p.shape[1]
    M = B * S

    # Embedding gather on the pre-padded bf16 table (lane-dense rows, half the
    # bytes of an f32 round trip).  See TODO at top about fully fusing it.
    x_emb = jnp.take(emb_p, tokens.reshape(-1), axis=0)  # (M, E_pad) bf16

    # Generation-aware row tiling:
    #  * v5e/v6e (1 TC): one big tile -> grid=(1,), no per-step overhead.
    #  * v7x (2 TCs):    even number of steps (ideally one per core) so the
    #                    "parallel" axis splits the work evenly.
    #  * very large M:   cap the tile at max_tile_m rows.
    steps = max(num_cores, pl.cdiv(M, max_tile_m))
    steps = pl.cdiv(steps, num_cores) * num_cores      # balanced across cores
    tm = _round_up(pl.cdiv(M, steps), 8)               # sublane-aligned rows
    M_pad = _round_up(M, tm)
    x_emb = jnp.pad(x_emb, ((0, M_pad - M), (0, 0)))

    out_flat = pl.pallas_call(
        _mlp_kernel,
        out_shape=jax.ShapeDtypeStruct((M_pad, O_pad), jnp.float32),
        grid_spec=pltpu.PrefetchScalarGridSpec(
            num_scalar_prefetch=0,
            grid=(M_pad // tm,),
            in_specs=[
                pl.BlockSpec((tm, E_pad), lambda i: (i, 0)),      # x tile
                pl.BlockSpec((E_pad, H_pad), lambda i: (0, 0)),   # w1 (resident)
                pl.BlockSpec((1, H_pad), lambda i: (0, 0)),       # b1
                pl.BlockSpec((H_pad, O_pad), lambda i: (0, 0)),   # w2 (resident)
                pl.BlockSpec((1, O_pad), lambda i: (0, 0)),       # b2
            ],
            out_specs=pl.BlockSpec((tm, O_pad), lambda i: (i, 0)),
        ),
        compiler_params=pltpu.CompilerParams(
            dimension_semantics=("parallel",),
            # At/below the v6e/v7x scoped default, above v5e's 16 MiB default;
            # actual footprint here is ~1 MB.
            vmem_limit_bytes=32 * 1024 * 1024,
        ),
    )(x_emb, w1_p, b1_p, w2_p, b2_p)

    # Padded tail rows (M..M_pad) and lanes (output_dim..O_pad) hold bias-only
    # garbage; this slice is load-bearing.
    return out_flat[:M, :output_dim].reshape(B, S, output_dim)


def reference_forward(tokens, emb_table, w1, b1, w2, b2):
    x = jnp.take(emb_table, tokens.reshape(-1), axis=0)
    h = jnp.maximum(x @ w1 + b1, 0.0)
    o = h @ w2 + b2
    return o.reshape(tokens.shape[0], tokens.shape[1], -1)


if __name__ == "__main__":
    # Shapes from the PyTorch spec: input (32, 20), vocab 10000, E=100, H=50, O=10.
    batch, seq = 32, 20
    vocab_size = 10000
    embedding_dim = 100
    hidden_dim = 50
    output_dim = 10

    key = jax.random.PRNGKey(0)
    k_tok, k_emb, k_w1, k_b1, k_w2, k_b2 = jax.random.split(key, 6)

    tokens = jax.random.randint(k_tok, (batch, seq), 0, vocab_size, dtype=jnp.int32)
    emb_table = jax.random.normal(k_emb, (vocab_size, embedding_dim), jnp.float32)
    # Linear weights stored as (in_dim, out_dim) = transpose of PyTorch's (out, in).
    w1 = jax.random.normal(k_w1, (embedding_dim, hidden_dim), jnp.float32) * 0.1
    b1 = jax.random.normal(k_b1, (hidden_dim,), jnp.float32) * 0.1
    w2 = jax.random.normal(k_w2, (hidden_dim, output_dim), jnp.float32) * 0.1
    b2 = jax.random.normal(k_b2, (output_dim,), jnp.float32) * 0.1

    # One-time model-init prep (hoisted out of the per-call path).
    params = prepare_params(emb_table, w1, b1, w2, b2)
    params = jax.block_until_ready(params)
    num_cores = _tensorcores_per_device()

    out = feedforward_nn(tokens, *params, output_dim=output_dim,
                         num_cores=num_cores)
    out = jax.block_until_ready(out)

    ref = reference_forward(tokens, emb_table, w1, b1, w2, b2)
    assert out.shape == (batch, seq, output_dim), out.shape
    # bf16 MXU inputs with f32 accumulation -> loose tolerance vs the f32 reference.
    max_err = float(jnp.abs(out - ref).max())
    assert jnp.allclose(out, ref, atol=5e-2, rtol=5e-2), max_err

    print("KERNEL_OK")
</pallas_src>

<mosaic_0001>
module attributes {stable_mosaic.version = 11 : i64} {
  func.func @_mlp_kernel(%arg0: i32, %arg1: memref<640x128xbf16, #tpu.memory_space<vmem>>, %arg2: memref<128x128xbf16, #tpu.memory_space<vmem>>, %arg3: memref<1x128xf32, #tpu.memory_space<vmem>>, %arg4: memref<128x128xbf16, #tpu.memory_space<vmem>>, %arg5: memref<1x128xf32, #tpu.memory_space<vmem>>, %arg6: memref<640x128xf32, #tpu.memory_space<vmem>>) attributes {dimension_semantics = [#tpu.dimension_semantics<parallel>], iteration_bounds = array<i64: 1>, scalar_prefetch = 0 : i64, scratch_operands = 0 : i64, tpu.core_type = #tpu.core_type<tc>, window_params = [{transform_indices = @transform_0, window_bounds = array<i64: 640, 128>}, {pipeline_mode = #tpu.pipeline_mode<synchronous>, transform_indices = @transform_1, window_bounds = array<i64: 128, 128>}, {pipeline_mode = #tpu.pipeline_mode<synchronous>, transform_indices = @transform_2, window_bounds = array<i64: 1, 128>}, {pipeline_mode = #tpu.pipeline_mode<synchronous>, transform_indices = @transform_3, window_bounds = array<i64: 128, 128>}, {pipeline_mode = #tpu.pipeline_mode<synchronous>, transform_indices = @transform_4, window_bounds = array<i64: 1, 128>}, {transform_indices = @transform_5, window_bounds = array<i64: 640, 128>}]} {
    %c0 = arith.constant 0 : index
    %c0_0 = arith.constant 0 : index
    %0 = vector.load %arg1[%c0, %c0_0] : memref<640x128xbf16, #tpu.memory_space<vmem>>, vector<640x128xbf16>
    %c0_1 = arith.constant 0 : index
    %c0_2 = arith.constant 0 : index
    %1 = vector.load %arg2[%c0_1, %c0_2] : memref<128x128xbf16, #tpu.memory_space<vmem>>, vector<128x128xbf16>
    %cst = arith.constant dense<0.000000e+00> : vector<640x128xf32>
    %2 = tpu.matmul %0, %1, %cst {dimension_numbers = #tpu.dot_dimension_numbers<[1], [0], [0], [1], [0, 0, 1, 1], [], []>} : vector<640x128xbf16>, vector<128x128xbf16>, vector<640x128xf32> -> vector<640x128xf32>
    %c0_3 = arith.constant 0 : index
    %c0_4 = arith.constant 0 : index
    %3 = vector.load %arg3[%c0_3, %c0_4] : memref<1x128xf32, #tpu.memory_space<vmem>>, vector<1x128xf32>
    %4 = vector.broadcast %3 : vector<1x128xf32> to vector<640x128xf32>
    %5 = arith.addf %2, %4 : vector<640x128xf32>
    %cst_5 = arith.constant 0.000000e+00 : f32
    %6 = vector.broadcast %cst_5 : f32 to vector<640x128xf32>
    %7 = arith.maximumf %5, %6 : vector<640x128xf32>
    %8 = arith.truncf %7 : vector<640x128xf32> to vector<640x128xbf16>
    %c0_6 = arith.constant 0 : index
    %c0_7 = arith.constant 0 : index
    %9 = vector.load %arg4[%c0_6, %c0_7] : memref<128x128xbf16, #tpu.memory_space<vmem>>, vector<128x128xbf16>
    %cst_8 = arith.constant dense<0.000000e+00> : vector<640x128xf32>
    %10 = tpu.matmul %8, %9, %cst_8 {dimension_numbers = #tpu.dot_dimension_numbers<[1], [0], [0], [1], [0, 0, 1, 1], [], []>} : vector<640x128xbf16>, vector<128x128xbf16>, vector<640x128xf32> -> vector<640x128xf32>
    %c0_9 = arith.constant 0 : index
    %c0_10 = arith.constant 0 : index
    %11 = vector.load %arg5[%c0_9, %c0_10] : memref<1x128xf32, #tpu.memory_space<vmem>>, vector<1x128xf32>
    %12 = vector.broadcast %11 : vector<1x128xf32> to vector<640x128xf32>
    %13 = arith.addf %10, %12 : vector<640x128xf32>
    %c0_11 = arith.constant 0 : index
    %c0_12 = arith.constant 0 : index
    %14 = vector.load %arg6[%c0_11, %c0_12] : memref<640x128xf32, #tpu.memory_space<vmem>>, vector<640x128xf32>
    tpu.vector_store %arg6[%c0_11, %c0_12], %13 {strides = array<i32>} : memref<640x128xf32, #tpu.memory_space<vmem>>, vector<640x128xf32>,
    return
  }
  func.func @transform_0(%arg0: i32) -> (i32, i32) {
    %c0_i32 = arith.constant 0 : i32
    %c0_i32_0 = arith.constant 0 : i32
    return %arg0, %c0_i32 : i32, i32
  }
  func.func @transform_1(%arg0: i32) -> (i32, i32) {
    %c0_i32 = arith.constant 0 : i32
    %c0_i32_0 = arith.constant 0 : i32
    %c0_i32_1 = arith.constant 0 : i32
    return %c0_i32, %c0_i32_0 : i32, i32
  }
  func.func @transform_2(%arg0: i32) -> (i32, i32) {
    %c0_i32 = arith.constant 0 : i32
    %c0_i32_0 = arith.constant 0 : i32
    %c0_i32_1 = arith.constant 0 : i32
    return %c0_i32, %c0_i32_0 : i32, i32
  }
  func.func @transform_3(%arg0: i32) -> (i32, i32) {
    %c0_i32 = arith.constant 0 : i32
    %c0_i32_0 = arith.constant 0 : i32
    %c0_i32_1 = arith.constant 0 : i32
    return %c0_i32, %c0_i32_0 : i32, i32
  }
  func.func @transform_4(%arg0: i32) -> (i32, i32) {
    %c0_i32 = arith.constant 0 : i32
    %c0_i32_0 = arith.constant 0 : i32
    %c0_i32_1 = arith.constant 0 : i32
    return %c0_i32, %c0_i32_0 : i32, i32
  }
  func.func @transform_5(%arg0: i32) -> (i32, i32) {
    %c0_i32 = arith.constant 0 : i32
    %c0_i32_0 = arith.constant 0 : i32
    return %arg0, %c0_i32 : i32, i32
  }
}

</mosaic_0001>

<bundles_post_ra>
// kernel: feedforward_nn.1
= control target key start
LH: loop header
LB: loop body
LE: loop exit
PB: predicated region body
PF: predicated region fallthrough
CT: control target
= control target key end

     0   :  { %10 = vsyncpa [#allocation3], 0  ;;  %s2564_s0 = inlined_call_operand.vmem [shape: bf16[640,128], index: 0, kind: input, shape index: {}]   ;;  %s2565_s1 = inlined_call_operand.hbm [shape: bf16[128,128], index: 1, kind: input, shape index: {}]   ;;  %s2566_s2 = inlined_call_operand.hbm [shape: f32[1,128], index: 2, kind: input, shape index: {}]   ;;  %s2567_s3 = inlined_call_operand.hbm [shape: bf16[128,128], index: 3, kind: input, shape index: {}]   ;;  %s2568_s4 = inlined_call_operand.hbm [shape: f32[1,128], index: 4, kind: input, shape index: {}]   ;;  %s2569_s5 = inlined_call_operand.vmem [shape: f32[640,128], index: 5, kind: output, shape index: {}]  }
   0x1   :  { %11 = vsyncpa [#allocation5], 0 }
   0x2   :  { %12 = vsyncpa [#allocation8], 0  ;;  %s1949_s18 = smov [#allocation4]   ;;  %s1950_s20 = smov [#allocation2]  }
   0x3   :  { %s33_s19 = sshll.u32 %s1949_s18, 4  ;;  %s20_s21 = sshll.u32 %s1950_s20, 4  ;;  %s34_s19 = int_to_ptr.vmem [resolvable:$true] %s33_s19  ;;  %s1985_s21 = int_to_ptr.vmem [resolvable:$true] %s20_s21 }
   0x4   :  { %s1855_s24 = scalar_lea.hbm %s2566_s2, 16 }
   0x5   :  { %p1856_p0 = scmp.ne.s32.totalorder %s2566_s2, %s1855_s24  ;;  %p1859_p1 = scmp.lt.u32.totalorder %s1855_s24, %s2566_s2 }
   0x7   :  { %p1861_p2 = pnand %p1859_p1, %p1856_p0 }
   0x9   :  { %1864 = shalt.err (!%p1861_p2)
}
   0xa   :  { %s1865_s29 = scalar_lea.vmem %s34_s19, 16  ;;  %s1869_s30 = scalar_lea.vmem %s34_s19, 32 }
   0xb   :  { %p1866_p3 = scmp.ne.s32.totalorder %s34_s19, %s1865_s29  ;;  %p1870_p4 = scmp.lt.s32.totalorder %s34_s19, %s34_s19 }
   0xc   :  { %p1871_p5 = scmp.lt.s32.totalorder %s1869_s30, %s1865_s29 }
   0xe   :  { %p1872_p6 = por %p1871_p5, %p1870_p4 }
  0x10   :  { %p1873_p7 = pnand %p1872_p6, %p1866_p3 }
  0x12   :  { %1876 = shalt.err (!%p1873_p7)
}
  0x13   :  { %36 = dma.hbm_to_vmem [thread:$0]  %s2566_s2, 16, %s34_s19, [#allocation5]  }
  0x14   :  { %s1877_s10 = scalar_lea.hbm %s2565_s1, 1024 }
  0x15   :  { %p1878_p8 = scmp.ne.s32.totalorder %s2565_s1, %s1877_s10  ;;  %p1881_p9 = scmp.lt.u32.totalorder %s1877_s10, %s2565_s1 }
  0x17   :  { %p1883_p10 = pnand %p1881_p9, %p1878_p8 }
  0x19   :  { %1886 = shalt.err (!%p1883_p10)
}
  0x1a   :  { %s1887_s15 = scalar_lea.vmem %s1985_s21, 1024  ;;  %p1892_p12 = scmp.lt.s32.totalorder %s1985_s21, %s1985_s21 }
  0x1b   :  { %p1888_p11 = scmp.ne.s32.totalorder %s1985_s21, %s1887_s15  ;;  %p1893_p13 = scmp.lt.s32.totalorder %s1887_s15, %s1887_s15 }
  0x1d   :  { %p1894_p0 = por %p1893_p13, %p1892_p12 }
  0x1f   :  { %p1895_p1 = pnand %p1894_p0, %p1888_p11 }
  0x21   :  { %1898 = shalt.err (!%p1895_p1)
}
  0x22   :  { %s1951_s2 = smov 64   ;;  %s1952_s16 = smov 4  }
  0x23   :  { %26 = dma.hbm_to_vmem [thread:$0]  %s2565_s1, 1024, %s1985_s21, [#allocation3], %s1951_s2, %s1951_s2, %s1952_s16  }
  0x24   :  { %s1953_s19 = smov [#allocation6]   ;;  %s1954_s22 = smov [#allocation7]  }
  0x25   :  { %s42_s20 = sshll.u32 %s1953_s19, 4  ;;  %s55_s23 = sshll.u32 %s1954_s22, 4  ;;  %s43_s20 = int_to_ptr.vmem [resolvable:$true] %s42_s20  ;;  %s56_s23 = int_to_ptr.vmem [resolvable:$true] %s55_s23 }
  0x26   :  { %s1899_s26 = scalar_lea.hbm %s2567_s3, 1024 }
  0x27   :  { %p1900_p2 = scmp.ne.s32.totalorder %s2567_s3, %s1899_s26  ;;  %p1903_p3 = scmp.lt.u32.totalorder %s1899_s26, %s2567_s3 }
  0x29   :  { %p1905_p4 = pnand %p1903_p3, %p1900_p2 }
  0x2b   :  { %1908 = shalt.err (!%p1905_p4)
}
  0x2c   :  { %s1909_s1 = scalar_lea.vmem %s43_s20, 1024  ;;  %p1914_p6 = scmp.lt.s32.totalorder %s43_s20, %s43_s20 }
  0x2d   :  { %p1910_p5 = scmp.ne.s32.totalorder %s43_s20, %s1909_s1  ;;  %p1915_p7 = scmp.lt.s32.totalorder %s1909_s1, %s1909_s1 }
  0x2f   :  { %p1916_p8 = por %p1915_p7, %p1914_p6 }
  0x31   :  { %p1917_p9 = pnand %p1916_p8, %p1910_p5 }
  0x33   :  { %1920 = shalt.err (!%p1917_p9)
}
  0x34   :  { %48 = dma.hbm_to_vmem [thread:$0]  %s2567_s3, 1024, %s43_s20, [#allocation5], %s1951_s2, %s1951_s2, %s1952_s16  }
  0x35   :  { %s1921_s9 = scalar_lea.hbm %s2568_s4, 16 }
  0x36   :  { %p1922_p10 = scmp.ne.s32.totalorder %s2568_s4, %s1921_s9  ;;  %p1925_p11 = scmp.lt.u32.totalorder %s1921_s9, %s2568_s4 }
  0x38   :  { %p1927_p12 = pnand %p1925_p11, %p1922_p10 }
  0x3a   :  { %1930 = shalt.err (!%p1927_p12)
}
  0x3b   :  { %s1931_s14 = scalar_lea.vmem %s56_s23, 16  ;;  %s1935_s15 = scalar_lea.vmem %s56_s23, 32 }
  0x3c   :  { %p1932_p13 = scmp.ne.s32.totalorder %s56_s23, %s1931_s14  ;;  %p1936_p0 = scmp.lt.s32.totalorder %s56_s23, %s56_s23 }
  0x3d   :  { %p1937_p1 = scmp.lt.s32.totalorder %s1935_s15, %s1931_s14 }
  0x3f   :  { %p1938_p2 = por %p1937_p1, %p1936_p0 }
  0x41   :  { %p1939_p3 = pnand %p1938_p2, %p1932_p13 }
  0x43   :  { %1942 = shalt.err (!%p1939_p3)
}
  0x44   :  { %58 = dma.hbm_to_vmem [thread:$0]  %s2568_s4, 16, %s56_s23, [#allocation8]  }
  0x45   :  { %1943 = dma.done.wait [#allocation3], 1024  }
  0x46   :  { %1944 = vsyncadd [#allocation3], 4294966272 }
  0x47   :  { %1945 = dma.done.wait [#allocation5], 1040  }
  0x48   :  { %1946 = vsyncadd [#allocation5], 4294966256 }
  0x49   :  { %1947 = dma.done.wait [#allocation8], 16  }
  0x4a   :  { %1948 = vsyncadd [#allocation8], 4294967280  ;;  %v1799_v0 = vld [vmem:[#allocation2] sm:$0xff]   ;;  %v1800_v1 = vld [vmem:[#allocation2 + $0x8] sm:$0xff]  }
  0x4b   :  { %1601 = vmatprep.subr.bf16.mxu0 %v1799_v0  ;;  %v1801_v2 = vld [vmem:[#allocation2 + $0x10] sm:$0xff]   ;;  %v1802_v3 = vld [vmem:[#allocation2 + $0x18] sm:$0xff]   ;;  %v1803_v5 = vld [vmem:[#allocation2 + $0x20] sm:$0xff]  }
  0x4c   :  { %1602 = vmatpush3.bf16.msra.mxu0 %v1799_v0  ;;  %v1807_v4 = vld [vmem:[%s2564_s0] sm:$0xff]   ;;  %v1804_v6 = vld [vmem:[#allocation2 + $0x28] sm:$0xff]   ;;  %v1805_v7 = vld [vmem:[#allocation2 + $0x30] sm:$0xff]  }
  0x4d   :  { %1603 = vmatprep.subr.bf16.mxu0 %v1800_v1  ;;  %1617 = vmatprep.mubr.bf16.mxu0 %v1807_v4  ;;  %v1806_v8 = vld [vmem:[#allocation2 + $0x38] sm:$0xff]   ;;  %v1808_v9 = vld [vmem:[%s2564_s0 + $0x8] sm:$0xff]   ;;  %v1809_v10 = vld [vmem:[%s2564_s0 + $0x10] sm:$0xff]  }
  0x4e   :  { %v1810_v11 = vld [vmem:[%s2564_s0 + $0x18] sm:$0xff]   ;;  %v1811_v12 = vld [vmem:[%s2564_s0 + $0x20] sm:$0xff]   ;;  %v1812_v13 = vld [vmem:[%s2564_s0 + $0x28] sm:$0xff]  }
  0x4f   :  { %v1813_v14 = vld [vmem:[%s2564_s0 + $0x30] sm:$0xff]   ;;  %v1814_v15 = vld [vmem:[%s2564_s0 + $0x38] sm:$0xff]   ;;  %v1815_v16 = vld [vmem:[%s2564_s0 + $0x40] sm:$0xff]  }
  0x50   :  { %1604 = vmatpush3.bf16.msra.mxu0 %v1800_v1  ;;  %v1847_v17 = vld [vmem:[#allocation6] sm:$0xff]   ;;  %v1848_v18 = vld [vmem:[#allocation6 + $0x8] sm:$0xff]   ;;  %v1849_v20 = vld [vmem:[#allocation6 + $0x10] sm:$0xff]  }
  0x51   :  { %1605 = vmatprep.subr.bf16.mxu0 %v1801_v2  ;;  %1697 = vmatprep.subr.bf16.mxu1 %v1847_v17  ;;  %v1816_v19 = vld [vmem:[%s2564_s0 + $0x48] sm:$0xff]   ;;  %v1817_v21 = vld [vmem:[%s2564_s0 + $0x50] sm:$0xff]   ;;  %v1818_v23 = vld [vmem:[%s2564_s0 + $0x58] sm:$0xff]  }
  0x52   :  { %1698 = vmatpush3.bf16.msra.mxu1 %v1847_v17  ;;  %v1850_v22 = vld [vmem:[#allocation6 + $0x18] sm:$0xff]   ;;  %v1851_v24 = vld [vmem:[#allocation6 + $0x20] sm:$0xff]   ;;  %v1852_v26 = vld [vmem:[#allocation6 + $0x28] sm:$0xff]  }
  0x53   :  { %1699 = vmatprep.subr.bf16.mxu1 %v1848_v18  ;;  %v1819_v25 = vld [vmem:[%s2564_s0 + $0x60] sm:$0xff]   ;;  %v1820_v27 = vld [vmem:[%s2564_s0 + $0x68] sm:$0xff]   ;;  %v1821_v28 = vld [vmem:[%s2564_s0 + $0x70] sm:$0xff]  }
  0x54   :  { %1606 = vmatpush3.bf16.msra.mxu0 %v1801_v2  ;;  %v1822_v29 = vld [vmem:[%s2564_s0 + $0x78] sm:$0xff]   ;;  %v1823_v30 = vld [vmem:[%s2564_s0 + $0x80] sm:$0xff]   ;;  %v1824_v31 = vld [vmem:[%s2564_s0 + $0x88] sm:$0xff]  }
  0x55   :  { %1607 = vmatprep.subr.bf16.mxu0 %v1802_v3  ;;  %v1825_v32 = vld [vmem:[%s2564_s0 + $0x90] sm:$0xff]   ;;  %v1826_v33 = vld [vmem:[%s2564_s0 + $0x98] sm:$0xff]   ;;  %v1827_v34 = vld [vmem:[%s2564_s0 + $0xa0] sm:$0xff]  }
  0x56   :  { %1700 = vmatpush3.bf16.msra.mxu1 %v1848_v18  ;;  %v1828_v35 = vld [vmem:[%s2564_s0 + $0xa8] sm:$0xff]   ;;  %v1829_v36 = vld [vmem:[%s2564_s0 + $0xb0] sm:$0xff]   ;;  %v1830_v37 = vld [vmem:[%s2564_s0 + $0xb8] sm:$0xff]  }
  0x57   :  { %1701 = vmatprep.subr.bf16.mxu1 %v1849_v20  ;;  %v1853_v38 = vld [vmem:[#allocation6 + $0x30] sm:$0xff]   ;;  %v1854_v40 = vld [vmem:[#allocation6 + $0x38] sm:$0xff]   ;;  %v1833_v42 = vld [vmem:[%s2564_s0 + $0xd0] sm:$0xff]  }
  0x58   :  { %1608 = vmatpush3.bf16.msra.mxu0 %v1802_v3  ;;  %v1831_v39 = vld [vmem:[%s2564_s0 + $0xc0] sm:$0xff]   ;;  %v1832_v41 = vld [vmem:[%s2564_s0 + $0xc8] sm:$0xff]   ;;  %v1834_v43 = vld [vmem:[%s2564_s0 + $0xd8] sm:$0xff]  }
  0x59   :  { %1609 = vmatprep.subr.bf16.mxu0 %v1803_v5  ;;  %v1835_v44 = vld [vmem:[%s2564_s0 + $0xe0] sm:$0xff]   ;;  %v1836_v45 = vld [vmem:[%s2564_s0 + $0xe8] sm:$0xff]   ;;  %v1837_v46 = vld [vmem:[%s2564_s0 + $0xf0] sm:$0xff]  }
  0x5a   :  { %1702 = vmatpush3.bf16.msra.mxu1 %v1849_v20  ;;  %v1838_v47 = vld [vmem:[%s2564_s0 + $0xf8] sm:$0xff]   ;;  %v1839_v48 = vld [vmem:[%s2564_s0 + $0x100] sm:$0xff]   ;;  %v1840_v49 = vld [vmem:[%s2564_s0 + $0x108] sm:$0xff]  }
  0x5b   :  { %1703 = vmatprep.subr.bf16.mxu1 %v1850_v22  ;;  %v1841_v50 = vld [vmem:[%s2564_s0 + $0x110] sm:$0xff]   ;;  %v1842_v51 = vld [vmem:[%s2564_s0 + $0x118] sm:$0xff]   ;;  %v1843_v52 = vld [vmem:[%s2564_s0 + $0x120] sm:$0xff]  }
  0x5c   :  { %1610 = vmatpush3.bf16.msra.mxu0 %v1803_v5  ;;  %v1844_v53 = vld [vmem:[%s2564_s0 + $0x128] sm:$0xff]   ;;  %v1845_v54 = vld [vmem:[%s2564_s0 + $0x130] sm:$0xff]   ;;  %v1846_v55 = vld [vmem:[%s2564_s0 + $0x138] sm:$0xff]  }
  0x5d   :  { %1611 = vmatprep.subr.bf16.mxu0 %v1804_v6  ;;  %v2160_v56 = vld [vmem:[#allocation4] ss:$0 sm:$0xff] }
  0x5e   :  { %1704 = vmatpush3.bf16.msra.mxu1 %v1850_v22 }
  0x5f   :  { %1705 = vmatprep.subr.bf16.mxu1 %v1851_v24 }
  0x60   :  { %1612 = vmatpush3.bf16.msra.mxu0 %v1804_v6 }
  0x61   :  { %1613 = vmatprep.subr.bf16.mxu0 %v1805_v7 }
  0x62   :  { %1706 = vmatpush3.bf16.msra.mxu1 %v1851_v24 }
  0x63   :  { %1707 = vmatprep.subr.bf16.mxu1 %v1852_v26 }
  0x64   :  { %1614 = vmatpush3.bf16.msra.mxu0 %v1805_v7 }
  0x65   :  { %1615 = vmatprep.subr.bf16.mxu0 %v1806_v8 }
  0x66   :  { %1708 = vmatpush3.bf16.msra.mxu1 %v1852_v26 }
  0x67   :  { %1709 = vmatprep.subr.bf16.mxu1 %v1853_v38 }
  0x68   :  { %1616 = vmatpush3.bf16.msra.mxu0 %v1806_v8 }
  0x6a   :  { %1710 = vmatpush3.bf16.msra.mxu1 %v1853_v38 }
  0x6b   :  { %1618 = vmatmul.mubr.bf16.vlgmr.msra.gmra.mrb[0].mxu0 %v1808_v9  ;;  %1711 = vmatprep.subr.bf16.mxu1 %v1854_v40 }
  0x6c   :  { %1621 = vmatprep.mubr.bf16.mxu0 %v1809_v10 }
  0x6e   :  { %1712 = vmatpush3.bf16.msra.mxu1 %v1854_v40 }
  0x73   :  { %1622 = vmatmul.mubr.bf16.gmra.mrb[4].mxu0 %v1810_v11 }
  0x74   :  { %1625 = vmatprep.mubr.bf16.mxu0 %v1811_v12 }
  0x7b   :  { %1626 = vmatmul.mubr.bf16.gmra.mrb[8].mxu0 %v1812_v13 }
  0x7c   :  { %1629 = vmatprep.mubr.bf16.mxu0 %v1813_v14 }
  0x83   :  { %1630 = vmatmul.mubr.bf16.gmra.mrb[12].mxu0 %v1814_v15 }
  0x84   :  { %1633 = vmatprep.mubr.bf16.mxu0 %v1815_v16 }
  0x8b   :  { %1634 = vmatmul.mubr.bf16.gmra.mrb[16].mxu0 %v1816_v19 }
  0x8c   :  { %1637 = vmatprep.mubr.bf16.mxu0 %v1817_v21 }
  0x93   :  { %1638 = vmatmul.mubr.bf16.gmra.mrb[20].mxu0 %v1818_v23 }
  0x94   :  { %1641 = vmatprep.mubr.bf16.mxu0 %v1819_v25 }
  0x9b   :  { %1642 = vmatmul.mubr.bf16.gmra.mrb[24].mxu0 %v1820_v27 }
  0x9c   :  { %1645 = vmatprep.mubr.bf16.mxu0 %v1821_v28 }
  0xa3   :  { %1646 = vmatmul.mubr.bf16.gmra.mrb[28].mxu0 %v1822_v29 }
  0xa4   :  { %1649 = vmatprep.mubr.bf16.mxu0 %v1823_v30 }
  0xab   :  { %1650 = vmatmul.mubr.bf16.gmra.mrb[32].mxu0 %v1824_v31 }
  0xac   :  { %1653 = vmatprep.mubr.bf16.mxu0 %v1825_v32 }
  0xb3   :  { %1654 = vmatmul.mubr.bf16.gmra.mrb[36].mxu0 %v1826_v33 }
  0xb4   :  { %1657 = vmatprep.mubr.bf16.mxu0 %v1827_v34 }
  0xbb   :  { %1658 = vmatmul.mubr.bf16.gmra.mrb[40].mxu0 %v1828_v35 }
  0xbc   :  { %1661 = vmatprep.mubr.bf16.mxu0 %v1829_v36 }
  0xc3   :  { %1662 = vmatmul.mubr.bf16.gmra.mrb[44].mxu0 %v1830_v37 }
  0xc4   :  { %1665 = vmatprep.mubr.bf16.mxu0 %v1831_v39 }
  0xcb   :  { %1666 = vmatmul.mubr.bf16.gmra.mrb[48].mxu0 %v1832_v41 }
  0xcc   :  { %1669 = vmatprep.mubr.bf16.mxu0 %v1833_v42 }
  0xd3   :  { %1670 = vmatmul.mubr.bf16.gmra.mrb[52].mxu0 %v1834_v43 }
  0xd4   :  { %1673 = vmatprep.mubr.bf16.mxu0 %v1835_v44 }
  0xdb   :  { %1674 = vmatmul.mubr.bf16.gmra.mrb[56].mxu0 %v1836_v45 }
  0xdc   :  { %1677 = vmatprep.mubr.bf16.mxu0 %v1837_v46 }
  0xe3   :  { %1678 = vmatmul.mubr.bf16.gmra.mrb[60].mxu0 %v1838_v47 }
  0xe4   :  { %1681 = vmatprep.mubr.bf16.mxu0 %v1839_v48 }
  0xeb   :  { %1682 = vmatmul.mubr.bf16.gmra.mrb[64].mxu0 %v1840_v49 }
  0xec   :  { %1685 = vmatprep.mubr.bf16.mxu0 %v1841_v50 }
  0xf3   :  { %1686 = vmatmul.mubr.bf16.gmra.mrb[68].mxu0 %v1842_v51 }
  0xf4   :  { %1689 = vmatprep.mubr.bf16.mxu0 %v1843_v52 }
  0xfb   :  { %1690 = vmatmul.mubr.bf16.gmra.mrb[72].mxu0 %v1844_v53 }
  0xfc   :  { %1693 = vmatprep.mubr.bf16.mxu0 %v1845_v54 }
 0x103   :  { %1694 = vmatmul.mubr.bf16.gmra.mrb[76].mxu0 %v1846_v55 }
 0x13e   :  { %v1619_v57 = vpop.f32.mrb[0].mxu0 }
 0x13f   :  { %v506_v58 = vadd.f32 %v1619_v57, %v2160_v56  ;;  %v497_v59 = vpop.f32.mrb[1].mxu0 }
 0x140   :  { %v498_v60 = vadd.f32 %v2160_v56, %v497_v59  ;;  %v1620_v61 = vpop.f32.mrb[2].mxu0 }
 0x141   :  { %v509_v62 = vadd.f32 %v1620_v61, %v2160_v56  ;;  %v500_v63 = vpop.f32.mrb[3].mxu0  ;;  %v818_v1 = vmax.f32 %v506_v58, 0.0 }
 0x142   :  { %v501_v0 = vadd.f32 %v2160_v56, %v500_v63  ;;  %v816_v3 = vmax.f32 %v498_v60, 0.0 }
 0x143   :  { %v819_v2 = vmax.f32 %v509_v62, 0.0 }
 0x144   :  { %v817_v4 = vmax.f32 %v501_v0, 0.0 }
 0x145   :  { %v897_v5 = vpack.c.bf16 %v819_v2, %v818_v1 }
 0x146   :  { %v1623_v6 = vpop.f32.mrb[4].mxu0  ;;  %v896_v7 = vpack.c.bf16 %v817_v4, %v816_v3 }
 0x147   :  { %v522_v8 = vadd.f32 %v1623_v6, %v2160_v56  ;;  %v513_v9 = vpop.f32.mrb[5].mxu0 }
 0x148   :  { %v514_v10 = vadd.f32 %v2160_v56, %v513_v9  ;;  %v1624_v11 = vpop.f32.mrb[6].mxu0  ;;  %1713 = vmatprep.mubr.bf16.mxu1 %v896_v7 }
 0x149   :  { %v525_v12 = vadd.f32 %v1624_v11, %v2160_v56  ;;  %v516_v13 = vpop.f32.mrb[7].mxu0  ;;  %1714 = vmatmul.mubr.bf16.vlgmr.msra.gmra.mrb[0].mxu1 %v897_v5  ;;  %v822_v15 = vmax.f32 %v522_v8, 0.0 }
 0x14a   :  { %v517_v14 = vadd.f32 %v2160_v56, %v516_v13  ;;  %v820_v17 = vmax.f32 %v514_v10, 0.0 }
 0x14b   :  { %v823_v16 = vmax.f32 %v525_v12, 0.0 }
 0x14c   :  { %v821_v18 = vmax.f32 %v517_v14, 0.0 }
 0x14d   :  { %v899_v19 = vpack.c.bf16 %v823_v16, %v822_v15 }
 0x14e   :  { %v898_v20 = vpack.c.bf16 %v821_v18, %v820_v17  ;;  %v1627_v21 = vpop.f32.mrb[8].mxu0 }
 0x14f   :  { %v538_v22 = vadd.f32 %v1627_v21, %v2160_v56  ;;  %v529_v23 = vpop.f32.mrb[9].mxu0 }
 0x150   :  { %v530_v24 = vadd.f32 %v2160_v56, %v529_v23  ;;  %v1628_v25 = vpop.f32.mrb[10].mxu0  ;;  %1717 = vmatprep.mubr.bf16.mxu1 %v898_v20 }
 0x151   :  { %v541_v26 = vadd.f32 %v1628_v25, %v2160_v56  ;;  %v532_v27 = vpop.f32.mrb[11].mxu0  ;;  %1718 = vmatmul.mubr.bf16.gmra.mrb[4].mxu1 %v899_v19  ;;  %v826_v29 = vmax.f32 %v538_v22, 0.0 }
 0x152   :  { %v533_v28 = vadd.f32 %v2160_v56, %v532_v27  ;;  %v824_v31 = vmax.f32 %v530_v24, 0.0 }
 0x153   :  { %v827_v30 = vmax.f32 %v541_v26, 0.0 }
 0x154   :  { %v825_v32 = vmax.f32 %v533_v28, 0.0 }
 0x155   :  { %v901_v33 = vpack.c.bf16 %v827_v30, %v826_v29 }
 0x156   :  { %v900_v34 = vpack.c.bf16 %v825_v32, %v824_v31  ;;  %v1631_v35 = vpop.f32.mrb[12].mxu0 }
 0x157   :  { %v554_v36 = vadd.f32 %v1631_v35, %v2160_v56  ;;  %v545_v37 = vpop.f32.mrb[13].mxu0 }
 0x158   :  { %v546_v38 = vadd.f32 %v2160_v56, %v545_v37  ;;  %v1632_v39 = vpop.f32.mrb[14].mxu0  ;;  %1721 = vmatprep.mubr.bf16.mxu1 %v900_v34 }
 0x159   :  { %v557_v40 = vadd.f32 %v1632_v39, %v2160_v56  ;;  %v548_v41 = vpop.f32.mrb[15].mxu0  ;;  %1722 = vmatmul.mubr.bf16.gmra.mrb[8].mxu1 %v901_v33  ;;  %v830_v43 = vmax.f32 %v554_v36, 0.0 }
 0x15a   :  { %v549_v42 = vadd.f32 %v2160_v56, %v548_v41  ;;  %v828_v45 = vmax.f32 %v546_v38, 0.0 }
 0x15b   :  { %v831_v44 = vmax.f32 %v557_v40, 0.0 }
 0x15c   :  { %v829_v46 = vmax.f32 %v549_v42, 0.0 }
 0x15d   :  { %v903_v47 = vpack.c.bf16 %v831_v44, %v830_v43 }
 0x15e   :  { %v902_v48 = vpack.c.bf16 %v829_v46, %v828_v45  ;;  %v1635_v49 = vpop.f32.mrb[16].mxu0 }
 0x15f   :  { %v570_v50 = vadd.f32 %v1635_v49, %v2160_v56  ;;  %v561_v51 = vpop.f32.mrb[17].mxu0 }
 0x160   :  { %v562_v52 = vadd.f32 %v2160_v56, %v561_v51  ;;  %v1636_v53 = vpop.f32.mrb[18].mxu0  ;;  %1725 = vmatprep.mubr.bf16.mxu1 %v902_v48 }
 0x161   :  { %v573_v54 = vadd.f32 %v1636_v53, %v2160_v56  ;;  %v564_v55 = vpop.f32.mrb[19].mxu0  ;;  %1726 = vmatmul.mubr.bf16.gmra.mrb[12].mxu1 %v903_v47  ;;  %v834_v58 = vmax.f32 %v570_v50, 0.0 }
 0x162   :  { %v565_v57 = vadd.f32 %v2160_v56, %v564_v55  ;;  %v832_v60 = vmax.f32 %v562_v52, 0.0 }
 0x163   :  { %v835_v59 = vmax.f32 %v573_v54, 0.0 }
 0x164   :  { %v833_v61 = vmax.f32 %v565_v57, 0.0 }
 0x165   :  { %v905_v62 = vpack.c.bf16 %v835_v59, %v834_v58 }
 0x166   :  { %v904_v63 = vpack.c.bf16 %v833_v61, %v832_v60  ;;  %v1639_v0 = vpop.f32.mrb[20].mxu0 }
 0x167   :  { %v586_v1 = vadd.f32 %v1639_v0, %v2160_v56  ;;  %v577_v2 = vpop.f32.mrb[21].mxu0 }
 0x168   :  { %v578_v3 = vadd.f32 %v2160_v56, %v577_v2  ;;  %v1640_v4 = vpop.f32.mrb[22].mxu0  ;;  %1729 = vmatprep.mubr.bf16.mxu1 %v904_v63 }
 0x169   :  { %v589_v5 = vadd.f32 %v1640_v4, %v2160_v56  ;;  %v580_v6 = vpop.f32.mrb[23].mxu0  ;;  %1730 = vmatmul.mubr.bf16.gmra.mrb[16].mxu1 %v905_v62  ;;  %v838_v8 = vmax.f32 %v586_v1, 0.0 }
 0x16a   :  { %v581_v7 = vadd.f32 %v2160_v56, %v580_v6  ;;  %v836_v10 = vmax.f32 %v578_v3, 0.0 }
 0x16b   :  { %v839_v9 = vmax.f32 %v589_v5, 0.0 }
 0x16c   :  { %v837_v11 = vmax.f32 %v581_v7, 0.0 }
 0x16d   :  { %v907_v12 = vpack.c.bf16 %v839_v9, %v838_v8 }
 0x16e   :  { %v906_v13 = vpack.c.bf16 %v837_v11, %v836_v10  ;;  %v1643_v14 = vpop.f32.mrb[24].mxu0 }
 0x16f   :  { %v602_v15 = vadd.f32 %v1643_v14, %v2160_v56  ;;  %v593_v16 = vpop.f32.mrb[25].mxu0 }
 0x170   :  { %v594_v17 = vadd.f32 %v2160_v56, %v593_v16  ;;  %v1644_v18 = vpop.f32.mrb[26].mxu0  ;;  %1733 = vmatprep.mubr.bf16.mxu1 %v906_v13 }
 0x171   :  { %v605_v19 = vadd.f32 %v1644_v18, %v2160_v56  ;;  %v596_v20 = vpop.f32.mrb[27].mxu0  ;;  %1734 = vmatmul.mubr.bf16.gmra.mrb[20].mxu1 %v907_v12  ;;  %v842_v22 = vmax.f32 %v602_v15, 0.0 }
 0x172   :  { %v597_v21 = vadd.f32 %v2160_v56, %v596_v20  ;;  %v840_v24 = vmax.f32 %v594_v17, 0.0 }
 0x173   :  { %v843_v23 = vmax.f32 %v605_v19, 0.0 }
 0x174   :  { %v841_v25 = vmax.f32 %v597_v21, 0.0 }
 0x175   :  { %v909_v26 = vpack.c.bf16 %v843_v23, %v842_v22 }
 0x176   :  { %v908_v27 = vpack.c.bf16 %v841_v25, %v840_v24  ;;  %v1647_v28 = vpop.f32.mrb[28].mxu0 }
 0x177   :  { %v618_v29 = vadd.f32 %v1647_v28, %v2160_v56  ;;  %v609_v30 = vpop.f32.mrb[29].mxu0 }
 0x178   :  { %v610_v31 = vadd.f32 %v2160_v56, %v609_v30  ;;  %v1648_v32 = vpop.f32.mrb[30].mxu0  ;;  %1737 = vmatprep.mubr.bf16.mxu1 %v908_v27 }
 0x179   :  { %v621_v33 = vadd.f32 %v1648_v32, %v2160_v56  ;;  %v612_v34 = vpop.f32.mrb[31].mxu0  ;;  %1738 = vmatmul.mubr.bf16.gmra.mrb[24].mxu1 %v909_v26  ;;  %v846_v36 = vmax.f32 %v618_v29, 0.0 }
 0x17a   :  { %v613_v35 = vadd.f32 %v2160_v56, %v612_v34  ;;  %v844_v38 = vmax.f32 %v610_v31, 0.0 }
 0x17b   :  { %v847_v37 = vmax.f32 %v621_v33, 0.0 }
 0x17c   :  { %v845_v39 = vmax.f32 %v613_v35, 0.0 }
 0x17d   :  { %v911_v40 = vpack.c.bf16 %v847_v37, %v846_v36 }
 0x17e   :  { %v910_v41 = vpack.c.bf16 %v845_v39, %v844_v38  ;;  %v1651_v42 = vpop.f32.mrb[32].mxu0 }
 0x17f   :  { %v634_v43 = vadd.f32 %v1651_v42, %v2160_v56  ;;  %v625_v44 = vpop.f32.mrb[33].mxu0 }
 0x180   :  { %v626_v45 = vadd.f32 %v2160_v56, %v625_v44  ;;  %v1652_v46 = vpop.f32.mrb[34].mxu0  ;;  %1741 = vmatprep.mubr.bf16.mxu1 %v910_v41 }
 0x181   :  { %v637_v47 = vadd.f32 %v1652_v46, %v2160_v56  ;;  %v628_v48 = vpop.f32.mrb[35].mxu0  ;;  %1742 = vmatmul.mubr.bf16.gmra.mrb[28].mxu1 %v911_v40  ;;  %v850_v50 = vmax.f32 %v634_v43, 0.0 }
 0x182   :  { %v629_v49 = vadd.f32 %v2160_v56, %v628_v48  ;;  %v848_v52 = vmax.f32 %v626_v45, 0.0 }
 0x183   :  { %v851_v51 = vmax.f32 %v637_v47, 0.0 }
 0x184   :  { %v849_v53 = vmax.f32 %v629_v49, 0.0 }
 0x185   :  { %v913_v54 = vpack.c.bf16 %v851_v51, %v850_v50 }
 0x186   :  { %v912_v55 = vpack.c.bf16 %v849_v53, %v848_v52  ;;  %v1655_v57 = vpop.f32.mrb[36].mxu0 }
 0x187   :  { %v650_v58 = vadd.f32 %v1655_v57, %v2160_v56  ;;  %v641_v59 = vpop.f32.mrb[37].mxu0 }
 0x188   :  { %v642_v60 = vadd.f32 %v2160_v56, %v641_v59  ;;  %v1656_v61 = vpop.f32.mrb[38].mxu0  ;;  %1745 = vmatprep.mubr.bf16.mxu1 %v912_v55 }
 0x189   :  { %v653_v62 = vadd.f32 %v1656_v61, %v2160_v56  ;;  %v644_v63 = vpop.f32.mrb[39].mxu0  ;;  %1746 = vmatmul.mubr.bf16.gmra.mrb[32].mxu1 %v913_v54  ;;  %v854_v1 = vmax.f32 %v650_v58, 0.0 }
 0x18a   :  { %v645_v0 = vadd.f32 %v2160_v56, %v644_v63  ;;  %v852_v3 = vmax.f32 %v642_v60, 0.0 }
 0x18b   :  { %v855_v2 = vmax.f32 %v653_v62, 0.0 }
 0x18c   :  { %v853_v4 = vmax.f32 %v645_v0, 0.0 }
 0x18d   :  { %v915_v5 = vpack.c.bf16 %v855_v2, %v854_v1 }
 0x18e   :  { %v914_v6 = vpack.c.bf16 %v853_v4, %v852_v3  ;;  %v1659_v7 = vpop.f32.mrb[40].mxu0 }
 0x18f   :  { %v666_v8 = vadd.f32 %v1659_v7, %v2160_v56  ;;  %v657_v9 = vpop.f32.mrb[41].mxu0 }
 0x190   :  { %v658_v10 = vadd.f32 %v2160_v56, %v657_v9  ;;  %v1660_v11 = vpop.f32.mrb[42].mxu0  ;;  %1749 = vmatprep.mubr.bf16.mxu1 %v914_v6 }
 0x191   :  { %v669_v12 = vadd.f32 %v1660_v11, %v2160_v56  ;;  %v660_v13 = vpop.f32.mrb[43].mxu0  ;;  %1750 = vmatmul.mubr.bf16.gmra.mrb[36].mxu1 %v915_v5  ;;  %v858_v15 = vmax.f32 %v666_v8, 0.0 }
 0x192   :  { %v661_v14 = vadd.f32 %v2160_v56, %v660_v13  ;;  %v856_v17 = vmax.f32 %v658_v10, 0.0 }
 0x193   :  { %v859_v16 = vmax.f32 %v669_v12, 0.0 }
 0x194   :  { %v857_v18 = vmax.f32 %v661_v14, 0.0 }
 0x195   :  { %v917_v19 = vpack.c.bf16 %v859_v16, %v858_v15 }
 0x196   :  { %v916_v20 = vpack.c.bf16 %v857_v18, %v856_v17  ;;  %v1663_v21 = vpop.f32.mrb[44].mxu0 }
 0x197   :  { %v682_v22 = vadd.f32 %v1663_v21, %v2160_v56  ;;  %v673_v23 = vpop.f32.mrb[45].mxu0 }
 0x198   :  { %v674_v24 = vadd.f32 %v2160_v56, %v673_v23  ;;  %v1664_v25 = vpop.f32.mrb[46].mxu0  ;;  %1753 = vmatprep.mubr.bf16.mxu1 %v916_v20 }
 0x199   :  { %v685_v26 = vadd.f32 %v1664_v25, %v2160_v56  ;;  %v676_v27 = vpop.f32.mrb[47].mxu0  ;;  %1754 = vmatmul.mubr.bf16.gmra.mrb[40].mxu1 %v917_v19  ;;  %v862_v29 = vmax.f32 %v682_v22, 0.0 }
 0x19a   :  { %v677_v28 = vadd.f32 %v2160_v56, %v676_v27  ;;  %v860_v31 = vmax.f32 %v674_v24, 0.0 }
 0x19b   :  { %v863_v30 = vmax.f32 %v685_v26, 0.0 }
 0x19c   :  { %v861_v32 = vmax.f32 %v677_v28, 0.0 }
 0x19d   :  { %v919_v33 = vpack.c.bf16 %v863_v30, %v862_v29 }
 0x19e   :  { %v918_v34 = vpack.c.bf16 %v861_v32, %v860_v31  ;;  %v1667_v35 = vpop.f32.mrb[48].mxu0 }
 0x19f   :  { %v698_v36 = vadd.f32 %v1667_v35, %v2160_v56  ;;  %v689_v37 = vpop.f32.mrb[49].mxu0 }
 0x1a0   :  { %v690_v38 = vadd.f32 %v2160_v56, %v689_v37  ;;  %v1668_v39 = vpop.f32.mrb[50].mxu0  ;;  %1757 = vmatprep.mubr.bf16.mxu1 %v918_v34 }
 0x1a1   :  { %v701_v40 = vadd.f32 %v1668_v39, %v2160_v56  ;;  %v692_v41 = vpop.f32.mrb[51].mxu0  ;;  %1758 = vmatmul.mubr.bf16.gmra.mrb[44].mxu1 %v919_v33  ;;  %v866_v43 = vmax.f32 %v698_v36, 0.0 }
 0x1a2   :  { %v693_v42 = vadd.f32 %v2160_v56, %v692_v41  ;;  %v864_v45 = vmax.f32 %v690_v38, 0.0 }
 0x1a3   :  { %v867_v44 = vmax.f32 %v701_v40, 0.0 }
 0x1a4   :  { %v865_v46 = vmax.f32 %v693_v42, 0.0 }
 0x1a5   :  { %v921_v47 = vpack.c.bf16 %v867_v44, %v866_v43 }
 0x1a6   :  { %v920_v48 = vpack.c.bf16 %v865_v46, %v864_v45  ;;  %v1671_v49 = vpop.f32.mrb[52].mxu0 }
 0x1a7   :  { %v714_v50 = vadd.f32 %v1671_v49, %v2160_v56  ;;  %v705_v51 = vpop.f32.mrb[53].mxu0 }
 0x1a8   :  { %v706_v52 = vadd.f32 %v2160_v56, %v705_v51  ;;  %v1672_v53 = vpop.f32.mrb[54].mxu0  ;;  %1761 = vmatprep.mubr.bf16.mxu1 %v920_v48 }
 0x1a9   :  { %v717_v54 = vadd.f32 %v1672_v53, %v2160_v56  ;;  %v708_v55 = vpop.f32.mrb[55].mxu0  ;;  %1762 = vmatmul.mubr.bf16.gmra.mrb[48].mxu1 %v921_v47  ;;  %v870_v58 = vmax.f32 %v714_v50, 0.0 }
 0x1aa   :  { %v709_v57 = vadd.f32 %v2160_v56, %v708_v55  ;;  %v868_v60 = vmax.f32 %v706_v52, 0.0 }
 0x1ab   :  { %v871_v59 = vmax.f32 %v717_v54, 0.0 }
 0x1ac   :  { %v869_v61 = vmax.f32 %v709_v57, 0.0 }
 0x1ad   :  { %v923_v62 = vpack.c.bf16 %v871_v59, %v870_v58 }
 0x1ae   :  { %v922_v63 = vpack.c.bf16 %v869_v61, %v868_v60  ;;  %v1675_v0 = vpop.f32.mrb[56].mxu0 }
 0x1af   :  { %v730_v1 = vadd.f32 %v1675_v0, %v2160_v56  ;;  %v721_v2 = vpop.f32.mrb[57].mxu0 }
 0x1b0   :  { %v722_v3 = vadd.f32 %v2160_v56, %v721_v2  ;;  %v1676_v4 = vpop.f32.mrb[58].mxu0  ;;  %1765 = vmatprep.mubr.bf16.mxu1 %v922_v63 }
 0x1b1   :  { %v733_v5 = vadd.f32 %v1676_v4, %v2160_v56  ;;  %v724_v6 = vpop.f32.mrb[59].mxu0  ;;  %1766 = vmatmul.mubr.bf16.gmra.mrb[52].mxu1 %v923_v62  ;;  %v874_v8 = vmax.f32 %v730_v1, 0.0 }
 0x1b2   :  { %v725_v7 = vadd.f32 %v2160_v56, %v724_v6  ;;  %v872_v10 = vmax.f32 %v722_v3, 0.0 }
 0x1b3   :  { %v875_v9 = vmax.f32 %v733_v5, 0.0 }
 0x1b4   :  { %v873_v11 = vmax.f32 %v725_v7, 0.0 }
 0x1b5   :  { %v925_v12 = vpack.c.bf16 %v875_v9, %v874_v8 }
 0x1b6   :  { %v924_v13 = vpack.c.bf16 %v873_v11, %v872_v10  ;;  %v1679_v14 = vpop.f32.mrb[60].mxu0 }
 0x1b7   :  { %v746_v15 = vadd.f32 %v1679_v14, %v2160_v56  ;;  %v737_v16 = vpop.f32.mrb[61].mxu0 }
 0x1b8   :  { %v738_v17 = vadd.f32 %v2160_v56, %v737_v16  ;;  %v1680_v18 = vpop.f32.mrb[62].mxu0  ;;  %1769 = vmatprep.mubr.bf16.mxu1 %v924_v13 }
 0x1b9   :  { %v749_v19 = vadd.f32 %v1680_v18, %v2160_v56  ;;  %v740_v20 = vpop.f32.mrb[63].mxu0  ;;  %1770 = vmatmul.mubr.bf16.gmra.mrb[56].mxu1 %v925_v12  ;;  %v878_v22 = vmax.f32 %v746_v15, 0.0 }
 0x1ba   :  { %v741_v21 = vadd.f32 %v2160_v56, %v740_v20  ;;  %v876_v24 = vmax.f32 %v738_v17, 0.0 }
 0x1bb   :  { %v879_v23 = vmax.f32 %v749_v19, 0.0 }
 0x1bc   :  { %v877_v25 = vmax.f32 %v741_v21, 0.0  ;;  %v2242_v21 = vld [vmem:[#allocation7] ss:$0 sm:$0xff] }
 0x1bd   :  { %v927_v26 = vpack.c.bf16 %v879_v23, %v878_v22 }
 0x1be   :  { %v926_v27 = vpack.c.bf16 %v877_v25, %v876_v24  ;;  %v1683_v28 = vpop.f32.mrb[64].mxu0 }
 0x1bf   :  { %v762_v29 = vadd.f32 %v1683_v28, %v2160_v56  ;;  %v753_v30 = vpop.f32.mrb[65].mxu0 }
 0x1c0   :  { %v754_v31 = vadd.f32 %v2160_v56, %v753_v30  ;;  %v1684_v32 = vpop.f32.mrb[66].mxu0  ;;  %1773 = vmatprep.mubr.bf16.mxu1 %v926_v27 }
 0x1c1   :  { %v765_v33 = vadd.f32 %v1684_v32, %v2160_v56  ;;  %v756_v34 = vpop.f32.mrb[67].mxu0  ;;  %1774 = vmatmul.mubr.bf16.gmra.mrb[60].mxu1 %v927_v26  ;;  %v882_v36 = vmax.f32 %v762_v29, 0.0 }
 0x1c2   :  { %v757_v35 = vadd.f32 %v2160_v56, %v756_v34  ;;  %v880_v38 = vmax.f32 %v754_v31, 0.0 }
 0x1c3   :  { %v883_v37 = vmax.f32 %v765_v33, 0.0 }
 0x1c4   :  { %v881_v39 = vmax.f32 %v757_v35, 0.0 }
 0x1c5   :  { %v929_v40 = vpack.c.bf16 %v883_v37, %v882_v36 }
 0x1c6   :  { %v928_v41 = vpack.c.bf16 %v881_v39, %v880_v38  ;;  %v1687_v42 = vpop.f32.mrb[68].mxu0 }
 0x1c7   :  { %v778_v43 = vadd.f32 %v1687_v42, %v2160_v56  ;;  %v769_v44 = vpop.f32.mrb[69].mxu0 }
 0x1c8   :  { %v770_v45 = vadd.f32 %v2160_v56, %v769_v44  ;;  %v1688_v46 = vpop.f32.mrb[70].mxu0  ;;  %1777 = vmatprep.mubr.bf16.mxu1 %v928_v41 }
 0x1c9   :  { %v781_v47 = vadd.f32 %v1688_v46, %v2160_v56  ;;  %v772_v48 = vpop.f32.mrb[71].mxu0  ;;  %1778 = vmatmul.mubr.bf16.gmra.mrb[64].mxu1 %v929_v40  ;;  %v886_v50 = vmax.f32 %v778_v43, 0.0 }
 0x1ca   :  { %v773_v49 = vadd.f32 %v2160_v56, %v772_v48  ;;  %v884_v52 = vmax.f32 %v770_v45, 0.0 }
 0x1cb   :  { %v887_v51 = vmax.f32 %v781_v47, 0.0 }
 0x1cc   :  { %v885_v53 = vmax.f32 %v773_v49, 0.0 }
 0x1cd   :  { %v931_v54 = vpack.c.bf16 %v887_v51, %v886_v50 }
 0x1ce   :  { %v930_v55 = vpack.c.bf16 %v885_v53, %v884_v52  ;;  %v1691_v57 = vpop.f32.mrb[72].mxu0 }
 0x1cf   :  { %v794_v58 = vadd.f32 %v1691_v57, %v2160_v56  ;;  %v785_v59 = vpop.f32.mrb[73].mxu0 }
 0x1d0   :  { %v786_v60 = vadd.f32 %v2160_v56, %v785_v59  ;;  %v1692_v61 = vpop.f32.mrb[74].mxu0  ;;  %1781 = vmatprep.mubr.bf16.mxu1 %v930_v55 }
 0x1d1   :  { %v797_v62 = vadd.f32 %v1692_v61, %v2160_v56  ;;  %v788_v63 = vpop.f32.mrb[75].mxu0  ;;  %1782 = vmatmul.mubr.bf16.gmra.mrb[68].mxu1 %v931_v54  ;;  %v890_v1 = vmax.f32 %v794_v58, 0.0 }
 0x1d2   :  { %v789_v0 = vadd.f32 %v2160_v56, %v788_v63  ;;  %v888_v3 = vmax.f32 %v786_v60, 0.0 }
 0x1d3   :  { %v891_v2 = vmax.f32 %v797_v62, 0.0 }
 0x1d4   :  { %v889_v4 = vmax.f32 %v789_v0, 0.0 }
 0x1d5   :  { %v933_v5 = vpack.c.bf16 %v891_v2, %v890_v1 }
 0x1d6   :  { %v932_v6 = vpack.c.bf16 %v889_v4, %v888_v3  ;;  %v1695_v7 = vpop.f32.mrb[76].mxu0 }
 0x1d7   :  { %v810_v8 = vadd.f32 %v1695_v7, %v2160_v56  ;;  %v801_v9 = vpop.f32.mrb[77].mxu0 }
 0x1d8   :  { %v802_v10 = vadd.f32 %v2160_v56, %v801_v9  ;;  %v1696_v11 = vpop.f32.mrb[78].mxu0  ;;  %1785 = vmatprep.mubr.bf16.mxu1 %v932_v6 }
 0x1d9   :  { %v813_v12 = vadd.f32 %v1696_v11, %v2160_v56  ;;  %v804_v13 = vpop.f32.mrb[79].mxu0  ;;  %1786 = vmatmul.mubr.bf16.gmra.mrb[72].mxu1 %v933_v5  ;;  %v894_v15 = vmax.f32 %v810_v8, 0.0 }
 0x1da   :  { %v805_v14 = vadd.f32 %v2160_v56, %v804_v13  ;;  %v892_v17 = vmax.f32 %v802_v10, 0.0 }
 0x1db   :  { %v895_v16 = vmax.f32 %v813_v12, 0.0 }
 0x1dc   :  { %v893_v18 = vmax.f32 %v805_v14, 0.0 }
 0x1dd   :  { %v935_v19 = vpack.c.bf16 %v895_v16, %v894_v15 }
 0x1de   :  { %v934_v20 = vpack.c.bf16 %v893_v18, %v892_v17 }
 0x1e0   :  { %1789 = vmatprep.mubr.bf16.mxu1 %v934_v20 }
 0x1e1   :  { %1790 = vmatmul.mubr.bf16.gmra.mrb[76].mxu1 %v935_v19 }
 0x21c   :  { %v1715_v22 = vpop.f32.mrb[0].mxu1 }
 0x21d   :  { %v1050_v23 = vadd.f32 %v1715_v22, %v2242_v21  ;;  %v1041_v24 = vpop.f32.mrb[1].mxu1 }
 0x21e   :  { %v1042_v25 = vadd.f32 %v2242_v21, %v1041_v24  ;;  %v1716_v26 = vpop.f32.mrb[2].mxu1 }
 0x21f   :  { %1362 = vst [vmem:[%s2569_s5 + $0x10] sm:$0xff] %v1050_v23  ;;  %v1053_v56 = vadd.f32 %v1716_v26, %v2242_v21  ;;  %v1044_v27 = vpop.f32.mrb[3].mxu1 }
 0x220   :  { %1360 = vst [vmem:[%s2569_s5] sm:$0xff] %v1042_v25  ;;  %v1045_v28 = vadd.f32 %v2242_v21, %v1044_v27 }
 0x221   :  { %1363 = vst [vmem:[%s2569_s5 + $0x18] sm:$0xff] %v1053_v56 }
 0x222   :  { %1361 = vst [vmem:[%s2569_s5 + $0x8] sm:$0xff] %v1045_v28 }
 0x224   :  { %v1719_v29 = vpop.f32.mrb[4].mxu1 }
 0x225   :  { %v1066_v30 = vadd.f32 %v1719_v29, %v2242_v21  ;;  %v1057_v31 = vpop.f32.mrb[5].mxu1 }
 0x226   :  { %v1058_v32 = vadd.f32 %v2242_v21, %v1057_v31  ;;  %v1720_v33 = vpop.f32.mrb[6].mxu1 }
 0x227   :  { %1366 = vst [vmem:[%s2569_s5 + $0x30] sm:$0xff] %v1066_v30  ;;  %v1069_v34 = vadd.f32 %v1720_v33, %v2242_v21  ;;  %v1060_v35 = vpop.f32.mrb[7].mxu1 }
 0x228   :  { %1364 = vst [vmem:[%s2569_s5 + $0x20] sm:$0xff] %v1058_v32  ;;  %v1061_v36 = vadd.f32 %v2242_v21, %v1060_v35 }
 0x229   :  { %1367 = vst [vmem:[%s2569_s5 + $0x38] sm:$0xff] %v1069_v34 }
 0x22a   :  { %1365 = vst [vmem:[%s2569_s5 + $0x28] sm:$0xff] %v1061_v36 }
 0x22c   :  { %v1723_v37 = vpop.f32.mrb[8].mxu1 }
 0x22d   :  { %v1082_v38 = vadd.f32 %v1723_v37, %v2242_v21  ;;  %v1073_v39 = vpop.f32.mrb[9].mxu1 }
 0x22e   :  { %v1074_v40 = vadd.f32 %v2242_v21, %v1073_v39  ;;  %v1724_v41 = vpop.f32.mrb[10].mxu1 }
 0x22f   :  { %1370 = vst [vmem:[%s2569_s5 + $0x50] sm:$0xff] %v1082_v38  ;;  %v1085_v42 = vadd.f32 %v1724_v41, %v2242_v21  ;;  %v1076_v43 = vpop.f32.mrb[11].mxu1 }
 0x230   :  { %1368 = vst [vmem:[%s2569_s5 + $0x40] sm:$0xff] %v1074_v40  ;;  %v1077_v44 = vadd.f32 %v2242_v21, %v1076_v43 }
 0x231   :  { %1371 = vst [vmem:[%s2569_s5 + $0x58] sm:$0xff] %v1085_v42 }
 0x232   :  { %1369 = vst [vmem:[%s2569_s5 + $0x48] sm:$0xff] %v1077_v44 }
 0x234   :  { %v1727_v45 = vpop.f32.mrb[12].mxu1 }
 0x235   :  { %v1098_v46 = vadd.f32 %v1727_v45, %v2242_v21  ;;  %v1089_v47 = vpop.f32.mrb[13].mxu1 }
 0x236   :  { %v1090_v48 = vadd.f32 %v2242_v21, %v1089_v47  ;;  %v1728_v49 = vpop.f32.mrb[14].mxu1 }
 0x237   :  { %1374 = vst [vmem:[%s2569_s5 + $0x70] sm:$0xff] %v1098_v46  ;;  %v1101_v50 = vadd.f32 %v1728_v49, %v2242_v21  ;;  %v1092_v51 = vpop.f32.mrb[15].mxu1 }
 0x238   :  { %1372 = vst [vmem:[%s2569_s5 + $0x60] sm:$0xff] %v1090_v48  ;;  %v1093_v52 = vadd.f32 %v2242_v21, %v1092_v51 }
 0x239   :  { %1375 = vst [vmem:[%s2569_s5 + $0x78] sm:$0xff] %v1101_v50 }
 0x23a   :  { %1373 = vst [vmem:[%s2569_s5 + $0x68] sm:$0xff] %v1093_v52 }
 0x23c   :  { %v1731_v53 = vpop.f32.mrb[16].mxu1 }
 0x23d   :  { %v1114_v54 = vadd.f32 %v1731_v53, %v2242_v21  ;;  %v1105_v55 = vpop.f32.mrb[17].mxu1 }
 0x23e   :  { %v1106_v57 = vadd.f32 %v2242_v21, %v1105_v55  ;;  %v1732_v58 = vpop.f32.mrb[18].mxu1 }
 0x23f   :  { %1378 = vst [vmem:[%s2569_s5 + $0x90] sm:$0xff] %v1114_v54  ;;  %v1117_v59 = vadd.f32 %v1732_v58, %v2242_v21  ;;  %v1108_v60 = vpop.f32.mrb[19].mxu1 }
 0x240   :  { %1376 = vst [vmem:[%s2569_s5 + $0x80] sm:$0xff] %v1106_v57  ;;  %v1109_v61 = vadd.f32 %v2242_v21, %v1108_v60 }
 0x241   :  { %1379 = vst [vmem:[%s2569_s5 + $0x98] sm:$0xff] %v1117_v59 }
 0x242   :  { %1377 = vst [vmem:[%s2569_s5 + $0x88] sm:$0xff] %v1109_v61 }
 0x244   :  { %v1735_v62 = vpop.f32.mrb[20].mxu1 }
 0x245   :  { %v1130_v63 = vadd.f32 %v1735_v62, %v2242_v21  ;;  %v1121_v0 = vpop.f32.mrb[21].mxu1 }
 0x246   :  { %v1122_v1 = vadd.f32 %v2242_v21, %v1121_v0  ;;  %v1736_v2 = vpop.f32.mrb[22].mxu1 }
 0x247   :  { %1382 = vst [vmem:[%s2569_s5 + $0xb0] sm:$0xff] %v1130_v63  ;;  %v1133_v3 = vadd.f32 %v1736_v2, %v2242_v21  ;;  %v1124_v4 = vpop.f32.mrb[23].mxu1 }
 0x248   :  { %1380 = vst [vmem:[%s2569_s5 + $0xa0] sm:$0xff] %v1122_v1  ;;  %v1125_v5 = vadd.f32 %v2242_v21, %v1124_v4 }
 0x249   :  { %1383 = vst [vmem:[%s2569_s5 + $0xb8] sm:$0xff] %v1133_v3 }
 0x24a   :  { %1381 = vst [vmem:[%s2569_s5 + $0xa8] sm:$0xff] %v1125_v5 }
 0x24c   :  { %v1739_v6 = vpop.f32.mrb[24].mxu1 }
 0x24d   :  { %v1146_v7 = vadd.f32 %v1739_v6, %v2242_v21  ;;  %v1137_v8 = vpop.f32.mrb[25].mxu1 }
 0x24e   :  { %v1138_v9 = vadd.f32 %v2242_v21, %v1137_v8  ;;  %v1740_v10 = vpop.f32.mrb[26].mxu1 }
 0x24f   :  { %1386 = vst [vmem:[%s2569_s5 + $0xd0] sm:$0xff] %v1146_v7  ;;  %v1149_v11 = vadd.f32 %v1740_v10, %v2242_v21  ;;  %v1140_v12 = vpop.f32.mrb[27].mxu1 }
 0x250   :  { %1384 = vst [vmem:[%s2569_s5 + $0xc0] sm:$0xff] %v1138_v9  ;;  %v1141_v13 = vadd.f32 %v2242_v21, %v1140_v12 }
 0x251   :  { %1387 = vst [vmem:[%s2569_s5 + $0xd8] sm:$0xff] %v1149_v11 }
 0x252   :  { %1385 = vst [vmem:[%s2569_s5 + $0xc8] sm:$0xff] %v1141_v13 }
 0x254   :  { %v1743_v14 = vpop.f32.mrb[28].mxu1 }
 0x255   :  { %v1162_v15 = vadd.f32 %v1743_v14, %v2242_v21  ;;  %v1153_v16 = vpop.f32.mrb[29].mxu1 }
 0x256   :  { %v1154_v17 = vadd.f32 %v2242_v21, %v1153_v16  ;;  %v1744_v18 = vpop.f32.mrb[30].mxu1 }
 0x257   :  { %1390 = vst [vmem:[%s2569_s5 + $0xf0] sm:$0xff] %v1162_v15  ;;  %v1165_v19 = vadd.f32 %v1744_v18, %v2242_v21  ;;  %v1156_v20 = vpop.f32.mrb[31].mxu1 }
 0x258   :  { %1388 = vst [vmem:[%s2569_s5 + $0xe0] sm:$0xff] %v1154_v17  ;;  %v1157_v22 = vadd.f32 %v2242_v21, %v1156_v20 }
 0x259   :  { %1391 = vst [vmem:[%s2569_s5 + $0xf8] sm:$0xff] %v1165_v19 }
 0x25a   :  { %1389 = vst [vmem:[%s2569_s5 + $0xe8] sm:$0xff] %v1157_v22 }
 0x25c   :  { %v1747_v23 = vpop.f32.mrb[32].mxu1 }
 0x25d   :  { %v1178_v24 = vadd.f32 %v1747_v23, %v2242_v21  ;;  %v1169_v25 = vpop.f32.mrb[33].mxu1 }
 0x25e   :  { %v1170_v26 = vadd.f32 %v2242_v21, %v1169_v25  ;;  %v1748_v56 = vpop.f32.mrb[34].mxu1 }
 0x25f   :  { %1394 = vst [vmem:[%s2569_s5 + $0x110] sm:$0xff] %v1178_v24  ;;  %v1181_v27 = vadd.f32 %v1748_v56, %v2242_v21  ;;  %v1172_v28 = vpop.f32.mrb[35].mxu1 }
 0x260   :  { %1392 = vst [vmem:[%s2569_s5 + $0x100] sm:$0xff] %v1170_v26  ;;  %v1173_v29 = vadd.f32 %v2242_v21, %v1172_v28 }
 0x261   :  { %1395 = vst [vmem:[%s2569_s5 + $0x118] sm:$0xff] %v1181_v27 }
 0x262   :  { %1393 = vst [vmem:[%s2569_s5 + $0x108] sm:$0xff] %v1173_v29 }
 0x264   :  { %v1751_v30 = vpop.f32.mrb[36].mxu1 }
 0x265   :  { %v1194_v31 = vadd.f32 %v1751_v30, %v2242_v21  ;;  %v1185_v32 = vpop.f32.mrb[37].mxu1 }
 0x266   :  { %v1186_v33 = vadd.f32 %v2242_v21, %v1185_v32  ;;  %v1752_v34 = vpop.f32.mrb[38].mxu1 }
 0x267   :  { %1398 = vst [vmem:[%s2569_s5 + $0x130] sm:$0xff] %v1194_v31  ;;  %v1197_v35 = vadd.f32 %v1752_v34, %v2242_v21  ;;  %v1188_v36 = vpop.f32.mrb[39].mxu1 }
 0x268   :  { %1396 = vst [vmem:[%s2569_s5 + $0x120] sm:$0xff] %v1186_v33  ;;  %v1189_v37 = vadd.f32 %v2242_v21, %v1188_v36 }
 0x269   :  { %1399 = vst [vmem:[%s2569_s5 + $0x138] sm:$0xff] %v1197_v35 }
 0x26a   :  { %1397 = vst [vmem:[%s2569_s5 + $0x128] sm:$0xff] %v1189_v37 }
 0x26c   :  { %v1755_v38 = vpop.f32.mrb[40].mxu1 }
 0x26d   :  { %v1210_v39 = vadd.f32 %v1755_v38, %v2242_v21  ;;  %v1201_v40 = vpop.f32.mrb[41].mxu1 }
 0x26e   :  { %v1202_v41 = vadd.f32 %v2242_v21, %v1201_v40  ;;  %v1756_v42 = vpop.f32.mrb[42].mxu1 }
 0x26f   :  { %1402 = vst [vmem:[%s2569_s5 + $0x150] sm:$0xff] %v1210_v39  ;;  %v1213_v43 = vadd.f32 %v1756_v42, %v2242_v21  ;;  %v1204_v44 = vpop.f32.mrb[43].mxu1 }
 0x270   :  { %1400 = vst [vmem:[%s2569_s5 + $0x140] sm:$0xff] %v1202_v41  ;;  %v1205_v45 = vadd.f32 %v2242_v21, %v1204_v44 }
 0x271   :  { %1403 = vst [vmem:[%s2569_s5 + $0x158] sm:$0xff] %v1213_v43 }
 0x272   :  { %1401 = vst [vmem:[%s2569_s5 + $0x148] sm:$0xff] %v1205_v45 }
 0x274   :  { %v1759_v46 = vpop.f32.mrb[44].mxu1 }
 0x275   :  { %v1226_v47 = vadd.f32 %v1759_v46, %v2242_v21  ;;  %v1217_v48 = vpop.f32.mrb[45].mxu1 }
 0x276   :  { %v1218_v49 = vadd.f32 %v2242_v21, %v1217_v48  ;;  %v1760_v50 = vpop.f32.mrb[46].mxu1 }
 0x277   :  { %1406 = vst [vmem:[%s2569_s5 + $0x170] sm:$0xff] %v1226_v47  ;;  %v1229_v51 = vadd.f32 %v1760_v50, %v2242_v21  ;;  %v1220_v52 = vpop.f32.mrb[47].mxu1 }
 0x278   :  { %1404 = vst [vmem:[%s2569_s5 + $0x160] sm:$0xff] %v1218_v49  ;;  %v1221_v53 = vadd.f32 %v2242_v21, %v1220_v52 }
 0x279   :  { %1407 = vst [vmem:[%s2569_s5 + $0x178] sm:$0xff] %v1229_v51 }
 0x27a   :  { %1405 = vst [vmem:[%s2569_s5 + $0x168] sm:$0xff] %v1221_v53 }
 0x27c   :  { %v1763_v54 = vpop.f32.mrb[48].mxu1 }
 0x27d   :  { %v1242_v55 = vadd.f32 %v1763_v54, %v2242_v21  ;;  %v1233_v57 = vpop.f32.mrb[49].mxu1 }
 0x27e   :  { %v1234_v58 = vadd.f32 %v2242_v21, %v1233_v57  ;;  %v1764_v59 = vpop.f32.mrb[50].mxu1 }
 0x27f   :  { %1410 = vst [vmem:[%s2569_s5 + $0x190] sm:$0xff] %v1242_v55  ;;  %v1245_v60 = vadd.f32 %v1764_v59, %v2242_v21  ;;  %v1236_v61 = vpop.f32.mrb[51].mxu1 }
 0x280   :  { %1408 = vst [vmem:[%s2569_s5 + $0x180] sm:$0xff] %v1234_v58  ;;  %v1237_v62 = vadd.f32 %v2242_v21, %v1236_v61 }
 0x281   :  { %1411 = vst [vmem:[%s2569_s5 + $0x198] sm:$0xff] %v1245_v60 }
 0x282   :  { %1409 = vst [vmem:[%s2569_s5 + $0x188] sm:$0xff] %v1237_v62 }
 0x284   :  { %v1767_v63 = vpop.f32.mrb[52].mxu1 }
 0x285   :  { %v1258_v0 = vadd.f32 %v1767_v63, %v2242_v21  ;;  %v1249_v1 = vpop.f32.mrb[53].mxu1 }
 0x286   :  { %v1250_v2 = vadd.f32 %v2242_v21, %v1249_v1  ;;  %v1768_v3 = vpop.f32.mrb[54].mxu1 }
 0x287   :  { %1414 = vst [vmem:[%s2569_s5 + $0x1b0] sm:$0xff] %v1258_v0  ;;  %v1261_v4 = vadd.f32 %v1768_v3, %v2242_v21  ;;  %v1252_v5 = vpop.f32.mrb[55].mxu1 }
 0x288   :  { %1412 = vst [vmem:[%s2569_s5 + $0x1a0] sm:$0xff] %v1250_v2  ;;  %v1253_v6 = vadd.f32 %v2242_v21, %v1252_v5 }
 0x289   :  { %1415 = vst [vmem:[%s2569_s5 + $0x1b8] sm:$0xff] %v1261_v4 }
 0x28a   :  { %1413 = vst [vmem:[%s2569_s5 + $0x1a8] sm:$0xff] %v1253_v6 }
 0x28c   :  { %v1771_v7 = vpop.f32.mrb[56].mxu1 }
 0x28d   :  { %v1274_v8 = vadd.f32 %v1771_v7, %v2242_v21  ;;  %v1265_v9 = vpop.f32.mrb[57].mxu1 }
 0x28e   :  { %v1266_v10 = vadd.f32 %v2242_v21, %v1265_v9  ;;  %v1772_v11 = vpop.f32.mrb[58].mxu1 }
 0x28f   :  { %1418 = vst [vmem:[%s2569_s5 + $0x1d0] sm:$0xff] %v1274_v8  ;;  %v1277_v12 = vadd.f32 %v1772_v11, %v2242_v21  ;;  %v1268_v13 = vpop.f32.mrb[59].mxu1 }
 0x290   :  { %1416 = vst [vmem:[%s2569_s5 + $0x1c0] sm:$0xff] %v1266_v10  ;;  %v1269_v14 = vadd.f32 %v2242_v21, %v1268_v13 }
 0x291   :  { %1419 = vst [vmem:[%s2569_s5 + $0x1d8] sm:$0xff] %v1277_v12 }
 0x292   :  { %1417 = vst [vmem:[%s2569_s5 + $0x1c8] sm:$0xff] %v1269_v14 }
 0x294   :  { %v1775_v15 = vpop.f32.mrb[60].mxu1 }
 0x295   :  { %v1290_v16 = vadd.f32 %v1775_v15, %v2242_v21  ;;  %v1281_v17 = vpop.f32.mrb[61].mxu1 }
 0x296   :  { %v1282_v18 = vadd.f32 %v2242_v21, %v1281_v17  ;;  %v1776_v19 = vpop.f32.mrb[62].mxu1 }
 0x297   :  { %1422 = vst [vmem:[%s2569_s5 + $0x1f0] sm:$0xff] %v1290_v16  ;;  %v1293_v20 = vadd.f32 %v1776_v19, %v2242_v21  ;;  %v1284_v22 = vpop.f32.mrb[63].mxu1 }
 0x298   :  { %1420 = vst [vmem:[%s2569_s5 + $0x1e0] sm:$0xff] %v1282_v18  ;;  %v1285_v23 = vadd.f32 %v2242_v21, %v1284_v22 }
 0x299   :  { %1423 = vst [vmem:[%s2569_s5 + $0x1f8] sm:$0xff] %v1293_v20 }
 0x29a   :  { %1421 = vst [vmem:[%s2569_s5 + $0x1e8] sm:$0xff] %v1285_v23 }
 0x29c   :  { %v1779_v24 = vpop.f32.mrb[64].mxu1 }
 0x29d   :  { %v1306_v25 = vadd.f32 %v1779_v24, %v2242_v21  ;;  %v1297_v26 = vpop.f32.mrb[65].mxu1 }
 0x29e   :  { %v1298_v56 = vadd.f32 %v2242_v21, %v1297_v26  ;;  %v1780_v27 = vpop.f32.mrb[66].mxu1 }
 0x29f   :  { %1426 = vst [vmem:[%s2569_s5 + $0x210] sm:$0xff] %v1306_v25  ;;  %v1309_v28 = vadd.f32 %v1780_v27, %v2242_v21  ;;  %v1300_v29 = vpop.f32.mrb[67].mxu1 }
 0x2a0   :  { %1424 = vst [vmem:[%s2569_s5 + $0x200] sm:$0xff] %v1298_v56  ;;  %v1301_v30 = vadd.f32 %v2242_v21, %v1300_v29 }
 0x2a1   :  { %1427 = vst [vmem:[%s2569_s5 + $0x218] sm:$0xff] %v1309_v28 }
 0x2a2   :  { %1425 = vst [vmem:[%s2569_s5 + $0x208] sm:$0xff] %v1301_v30 }
 0x2a4   :  { %v1783_v31 = vpop.f32.mrb[68].mxu1 }
 0x2a5   :  { %v1322_v32 = vadd.f32 %v1783_v31, %v2242_v21  ;;  %v1313_v33 = vpop.f32.mrb[69].mxu1 }
 0x2a6   :  { %v1314_v34 = vadd.f32 %v2242_v21, %v1313_v33  ;;  %v1784_v35 = vpop.f32.mrb[70].mxu1 }
 0x2a7   :  { %1430 = vst [vmem:[%s2569_s5 + $0x230] sm:$0xff] %v1322_v32  ;;  %v1325_v36 = vadd.f32 %v1784_v35, %v2242_v21  ;;  %v1316_v37 = vpop.f32.mrb[71].mxu1 }
 0x2a8   :  { %1428 = vst [vmem:[%s2569_s5 + $0x220] sm:$0xff] %v1314_v34  ;;  %v1317_v38 = vadd.f32 %v2242_v21, %v1316_v37 }
 0x2a9   :  { %1431 = vst [vmem:[%s2569_s5 + $0x238] sm:$0xff] %v1325_v36 }
 0x2aa   :  { %1429 = vst [vmem:[%s2569_s5 + $0x228] sm:$0xff] %v1317_v38 }
 0x2ac   :  { %v1787_v39 = vpop.f32.mrb[72].mxu1 }
 0x2ad   :  { %v1338_v40 = vadd.f32 %v1787_v39, %v2242_v21  ;;  %v1329_v41 = vpop.f32.mrb[73].mxu1 }
 0x2ae   :  { %v1330_v42 = vadd.f32 %v2242_v21, %v1329_v41  ;;  %v1788_v43 = vpop.f32.mrb[74].mxu1 }
 0x2af   :  { %1434 = vst [vmem:[%s2569_s5 + $0x250] sm:$0xff] %v1338_v40  ;;  %v1341_v44 = vadd.f32 %v1788_v43, %v2242_v21  ;;  %v1332_v45 = vpop.f32.mrb[75].mxu1 }
 0x2b0   :  { %1432 = vst [vmem:[%s2569_s5 + $0x240] sm:$0xff] %v1330_v42  ;;  %v1333_v46 = vadd.f32 %v2242_v21, %v1332_v45 }
 0x2b1   :  { %1435 = vst [vmem:[%s2569_s5 + $0x258] sm:$0xff] %v1341_v44 }
 0x2b2   :  { %1433 = vst [vmem:[%s2569_s5 + $0x248] sm:$0xff] %v1333_v46 }
 0x2b4   :  { %v1791_v47 = vpop.f32.mrb[76].mxu1 }
 0x2b5   :  { %v1354_v48 = vadd.f32 %v1791_v47, %v2242_v21  ;;  %v1345_v49 = vpop.f32.mrb[77].mxu1 }
 0x2b6   :  { %v1346_v50 = vadd.f32 %v2242_v21, %v1345_v49  ;;  %v1792_v51 = vpop.f32.mrb[78].mxu1 }
 0x2b7   :  { %1438 = vst [vmem:[%s2569_s5 + $0x270] sm:$0xff] %v1354_v48  ;;  %v1357_v52 = vadd.f32 %v1792_v51, %v2242_v21  ;;  %v1348_v53 = vpop.f32.mrb[79].mxu1 }
 0x2b8   :  { %1436 = vst [vmem:[%s2569_s5 + $0x260] sm:$0xff] %v1346_v50  ;;  %v1349_v54 = vadd.f32 %v2242_v21, %v1348_v53 }
 0x2b9   :  { %1439 = vst [vmem:[%s2569_s5 + $0x278] sm:$0xff] %v1357_v52 }
 0x2ba   :  { %1437 = vst [vmem:[%s2569_s5 + $0x268] sm:$0xff] %v1349_v54 }
 0x2bb   :  { %1444 = vsyncpa [#allocation3], 1 }
 0x2bc   :  { %1445 = vsyncpa [#allocation5], 1 }
 0x2bd   :  { %1446 = vsyncpa [#allocation8], 1 }

</bundles_post_ra>
